<compile_context>
chip_gen: v6e
topology: v6e:2x2x1
jax: 0.10.0
libtpu: 0.0.40
codegen_flags: <defaults>
</compile_context>

<pallas_src>
import math
from functools import partial

import jax
import jax.numpy as jnp
from jax import lax
from jax.experimental import pallas as pl
from jax.experimental.pallas import tpu as pltpu


# ----------------------------------------------------------------------------
# Kernel 1: fused patch embedding
#   Conv2d(k=stride=patch) as matmul + bias, cls-token prepend, positional
#   embedding add and zero-padding of the sequence, gridded over batch.
# ----------------------------------------------------------------------------
def _embed_kernel(p_ref, w_ref, b_ref, add_ref, o_ref, *, n_patches):
    # p_ref: (1, N, K) bf16, w_ref: (K, D) bf16, b_ref: (1, D) f32
    # add_ref: (S_pad, D) f32  (row 0 = cls + pe[0], rows 1..N = pe, rest = 0)
    proj = jnp.dot(p_ref[0], w_ref[...], preferred_element_type=jnp.float32)
    proj = proj + b_ref[...]                                   # [N, D] f32
    add = add_ref[...]
    s_pad, d = add.shape
    rows = [add[0:1, :], proj + add[1:n_patches + 1, :]]
    if s_pad > n_patches + 1:                                   # static
        rows.append(jnp.zeros((s_pad - n_patches - 1, d), jnp.float32))
    o_ref[0] = jnp.concatenate(rows, axis=0).astype(jnp.bfloat16)


def patch_embed_fused(patches, w_patch, b_patch, add_tab, *, n_patches):
    B, N, K = patches.shape
    D = w_patch.shape[1]
    S = add_tab.shape[0]
    return pl.pallas_call(
        partial(_embed_kernel, n_patches=n_patches),
        out_shape=jax.ShapeDtypeStruct((B, S, D), jnp.bfloat16),
        grid=(B,),
        in_specs=[
            pl.BlockSpec((1, N, K), lambda b: (b, 0, 0)),
            pl.BlockSpec((K, D), lambda b: (0, 0)),
            pl.BlockSpec((1, D), lambda b: (0, 0)),
            pl.BlockSpec((S, D), lambda b: (0, 0)),
        ],
        out_specs=pl.BlockSpec((1, S, D), lambda b: (b, 0, 0)),
        compiler_params=pltpu.CompilerParams(
            dimension_semantics=("parallel",)),
    )(patches, w_patch, b_patch, add_tab)


# ----------------------------------------------------------------------------
# Kernel 2: one transformer encoder layer
#   grid = (B, F // ff_tile).  MHA at f == 0, FF dim streamed over f, f32
#   accumulator in VMEM scratch, output written at the last f chunk.
# ----------------------------------------------------------------------------
def _encoder_layer_kernel(
    x_ref,
    ln1g_ref, ln1b_ref,
    wqkv_ref, bqkv_ref,
    woh_ref, bo_ref,
    ln2g_ref, ln2b_ref,
    w1_ref, b1_ref, w2_ref, b2_ref,
    o_ref,
    xmid_ref, xn2_ref, acc_ref,
    *, n_heads, s_real,
):
    f = pl.program_id(1)
    n_f = pl.num_programs(1)
    S, D = xmid_ref.shape
    dh = D // n_heads
    eps = 1e-5

    def layer_norm(v, g, b):
        mu = jnp.mean(v, axis=-1, keepdims=True)
        var = jnp.mean((v - mu) ** 2, axis=-1, keepdims=True)
        return (v - mu) * lax.rsqrt(var + eps) * g + b

    # --- multi-head self attention (pre-norm), once per batch row ---
    @pl.when(f == 0)
    def _attention_block():
        x = x_ref[0].astype(jnp.float32)                          # [S, D]
        xn = layer_norm(x, ln1g_ref[...], ln1b_ref[...])
        # fused QKV projection; 1/sqrt(dh) pre-folded into Q columns of wqkv
        qkv = jnp.dot(xn.astype(jnp.bfloat16), wqkv_ref[...],
                      preferred_element_type=jnp.float32) + bqkv_ref[...]   # [S, 3D]

        if s_real < S:                                            # static
            kmask = lax.broadcasted_iota(jnp.int32, (1, S), 1) < s_real

        attn = jnp.zeros((S, D), jnp.float32)
        for h in range(n_heads):                                  # static unroll
            qh = qkv[:, h * dh:(h + 1) * dh].astype(jnp.bfloat16)
            kh = qkv[:, D + h * dh:D + (h + 1) * dh].astype(jnp.bfloat16)
            vh = qkv[:, 2 * D + h * dh:2 * D + (h + 1) * dh].astype(jnp.bfloat16)
            # q @ k^T as an NT contraction on the last dims (no explicit kh.T)
            s = lax.dot_general(qh, kh, (((1,), (1,)), ((), ())),
                                preferred_element_type=jnp.float32)  # [S, S]
            if s_real < S:
                s = jnp.where(kmask, s, -1e30)                    # mask padded keys
            s = s - jnp.max(s, axis=-1, keepdims=True)
            p = jnp.exp(s)
            p = p * pl.reciprocal(jnp.sum(p, axis=-1, keepdims=True), approx=True)
            oh = jnp.dot(p.astype(jnp.bfloat16), vh,
                         preferred_element_type=jnp.float32)      # [S, dh]
            # concat-free output projection: accumulate head_h @ wo[h]
            attn = attn + jnp.dot(oh.astype(jnp.bfloat16), woh_ref[h],
                                  preferred_element_type=jnp.float32)

        x_mid = x + attn + bo_ref[...]
        xmid_ref[...] = x_mid
        xn2_ref[...] = layer_norm(x_mid, ln2g_ref[...],
                                  ln2b_ref[...]).astype(jnp.bfloat16)
        acc_ref[...] = jnp.zeros_like(acc_ref)

    # --- MLP (pre-norm): one FF-dim chunk per grid step, f32 accumulation ---
    h1 = jnp.dot(xn2_ref[...], w1_ref[...],
                 preferred_element_type=jnp.float32) + b1_ref[...]           # [S, tf]
    # TODO(synk): reference nn.GELU is erf-exact; tanh-approx used for lowering.
    h1 = jax.nn.gelu(h1, approximate=True)
    acc_ref[...] += jnp.dot(h1.astype(jnp.bfloat16), w2_ref[...],
                            preferred_element_type=jnp.float32)              # [S, D]

    @pl.when(f == n_f - 1)
    def _finalize():
        o_ref[0] = (xmid_ref[...] + acc_ref[...]
                    + b2_ref[...]).astype(jnp.bfloat16)


def _const_spec(shape, single_buffer=True):
    """Full-block, constant-index spec; single-buffered if supported."""
    nd = len(shape)
    imap = lambda *_: (0,) * nd
    if single_buffer and hasattr(pl, "Buffered"):
        try:
            return pl.BlockSpec(shape, imap, pipeline_mode=pl.Buffered(1))
        except Exception:
            pass
    return pl.BlockSpec(shape, imap)


def encoder_layer(x, lp, *, n_heads, s_real, ff_tile):
    B, S, D = x.shape
    F = lp["w1"].shape[1]
    kf = F // ff_tile

    in_specs = [
        pl.BlockSpec((1, S, D), lambda b, f: (b, 0, 0)),       # x (per batch row)
        _const_spec(lp["ln1g"].shape), _const_spec(lp["ln1b"].shape),
        _const_spec(lp["wqkv"].shape), _const_spec(lp["bqkv"].shape),
        _const_spec(lp["woh"].shape), _const_spec(lp["bo"].shape),
        _const_spec(lp["ln2g"].shape), _const_spec(lp["ln2b"].shape),
        pl.BlockSpec((D, ff_tile), lambda b, f: (0, f)),       # w1: streamed over f
        pl.BlockSpec((1, ff_tile), lambda b, f: (0, f)),       # b1
        pl.BlockSpec((ff_tile, D), lambda b, f: (f, 0)),       # w2: streamed over f
        _const_spec(lp["b2"].shape),
    ]
    operands = (x, lp["ln1g"], lp["ln1b"], lp["wqkv"], lp["bqkv"],
                lp["woh"], lp["bo"], lp["ln2g"], lp["ln2b"],
                lp["w1"], lp["b1"], lp["w2"], lp["b2"])

    return pl.pallas_call(
        partial(_encoder_layer_kernel, n_heads=n_heads, s_real=s_real),
        out_shape=jax.ShapeDtypeStruct((B, S, D), jnp.bfloat16),
        grid=(B, kf),
        in_specs=in_specs,
        out_specs=pl.BlockSpec((1, S, D), lambda b, f: (b, 0, 0)),
        scratch_shapes=[
            pltpu.VMEM((S, D), jnp.float32),    # x after attention residual
            pltpu.VMEM((S, D), jnp.bfloat16),   # LN2(x_mid), reused by FF chunks
            pltpu.VMEM((S, D), jnp.float32),    # FF accumulator
        ],
        compiler_params=pltpu.CompilerParams(
            dimension_semantics=("parallel", "arbitrary"),
            vmem_limit_bytes=48 * 1024 * 1024),
    )(*operands)


# ----------------------------------------------------------------------------
# Kernel 3: cls-token projection + L2 normalization (cls rows only)
# ----------------------------------------------------------------------------
def _head_kernel(cls_ref, proj_ref, o_ref):
    y = jnp.dot(cls_ref[...], proj_ref[...],
                preferred_element_type=jnp.float32)              # [B, E]
    inv = lax.rsqrt(jnp.sum(y * y, axis=-1, keepdims=True) + 1e-12)
    o_ref[...] = y * inv


def head(cls_tokens, projection):
    B = cls_tokens.shape[0]
    E = projection.shape[1]
    return pl.pallas_call(
        _head_kernel,
        out_shape=jax.ShapeDtypeStruct((B, E), jnp.float32),
    )(cls_tokens, projection)


# ----------------------------------------------------------------------------
# Glue: positional embedding, parameter init / preparation, forward pass
# ----------------------------------------------------------------------------
def sinusoidal_pe(seq_len, d_model):
    pos = jnp.arange(seq_len, dtype=jnp.float32)[:, None]
    i = jnp.arange(d_model)[None, :]
    even = (i % 2 == 0)
    exponent = jnp.where(even, i, i - 1).astype(jnp.float32) / d_model
    angle = pos / (10000.0 ** exponent)
    return jnp.where(even, jnp.sin(angle), jnp.cos(angle))      # [S, D]


def init_layer_params(key, d_model, ff_dim, scale=0.02):
    ks = jax.random.split(key, 6)
    f32 = jnp.float32
    return dict(
        ln1g=jnp.ones((1, d_model), f32), ln1b=jnp.zeros((1, d_model), f32),
        wq=jax.random.normal(ks[0], (d_model, d_model), f32) * scale,
        bq=jnp.zeros((1, d_model), f32),
        wk=jax.random.normal(ks[1], (d_model, d_model), f32) * scale,
        bk=jnp.zeros((1, d_model), f32),
        wv=jax.random.normal(ks[2], (d_model, d_model), f32) * scale,
        bv=jnp.zeros((1, d_model), f32),
        wo=jax.random.normal(ks[3], (d_model, d_model), f32) * scale,
        bo=jnp.zeros((1, d_model), f32),
        ln2g=jnp.ones((1, d_model), f32), ln2b=jnp.zeros((1, d_model), f32),
        w1=jax.random.normal(ks[4], (d_model, ff_dim), f32) * scale,
        b1=jnp.zeros((1, ff_dim), f32),
        w2=jax.random.normal(ks[5], (ff_dim, d_model), f32) * scale,
        b2=jnp.zeros((1, d_model), f32),
    )


def prepare_layer_params(lp, n_heads):
    """Kernel-friendly layout: fused bf16 QKV (scale folded into Q), head-major wo."""
    D = lp["wq"].shape[0]
    dh = D // n_heads
    sc = 1.0 / math.sqrt(dh)
    wqkv = jnp.concatenate([lp["wq"] * sc, lp["wk"], lp["wv"]], axis=1)
    bqkv = jnp.concatenate([lp["bq"] * sc, lp["bk"], lp["bv"]], axis=1)
    return dict(
        ln1g=lp["ln1g"], ln1b=lp["ln1b"],
        wqkv=wqkv.astype(jnp.bfloat16), bqkv=bqkv,                     # bias stays f32
        woh=lp["wo"].reshape(n_heads, dh, D).astype(jnp.bfloat16),
        bo=lp["bo"],
        ln2g=lp["ln2g"], ln2b=lp["ln2b"],
        w1=lp["w1"].astype(jnp.bfloat16), b1=lp["b1"],
        w2=lp["w2"].astype(jnp.bfloat16), b2=lp["b2"],
    )


def _pick_ff_tile(ff_dim, target=512):
    if ff_dim <= target:
        return ff_dim
    for t in (512, 384, 256, 128):
        if ff_dim % t == 0:
            return t
    return ff_dim


def vit_encoder_forward(x, params, *, patch_size, n_heads):
    B, C, Himg, Wimg = x.shape
    ph, pw = patch_size
    Hn, Wn = Himg // ph, Wimg // pw
    N = Hn * Wn
    D = params["cls_token"].shape[-1]
    S_real = N + 1
    S_pad = ((S_real + 7) // 8) * 8        # sublane-aligned sequence length

    # Conv2d(k=stride=patch) == flatten patches in (C, ph, pw) order + matmul.
    patches = (
        x.reshape(B, C, Hn, ph, Wn, pw)
        .transpose(0, 2, 4, 1, 3, 5)
        .reshape(B, N, C * ph * pw)
    ).astype(jnp.bfloat16)

    # additive table fused into the embed kernel: row0 = cls + pe[0], rows 1..N = pe
    # TODO(synk): positional embedding assumed sinusoidal; swap table if learned.
    pe = params["pos_emb"]                                    # [S_real, D] f32
    add_tab = jnp.zeros((S_pad, D), jnp.float32).at[:S_real].set(pe)
    add_tab = add_tab.at[0].add(params["cls_token"][0, 0])

    tok = patch_embed_fused(
        patches, params["w_patch"].astype(jnp.bfloat16), params["b_patch"],
        add_tab, n_patches=N)                                 # [B, S_pad, D] bf16

    ff_dim = params["layers"][0]["w1"].shape[1]
    ff_tile = _pick_ff_tile(ff_dim)
    # TODO(synk): whole-stack single pallas_call (layer grid axis) left out; each
    # layer is one pallas_call so the token stream bounces through HBM per layer.
    for lp in params["layers"]:
        plp = prepare_layer_params(lp, n_heads)
        tok = encoder_layer(tok, plp, n_heads=n_heads,
                            s_real=S_real, ff_tile=ff_tile)

    cls_tok = tok[:, 0, :]                                    # only cls rows to the head
    return head(cls_tok, params["projection"].astype(jnp.bfloat16))   # [B, E], L2-norm


# ----------------------------------------------------------------------------
if __name__ == "__main__":
    # small config consistent with the module's constructor
    B, n_channels = 2, 3
    image_size = (16, 16)
    patch_size = (8, 8)
    d_model, n_heads, n_layers, ff_dim = 32, 4, 2, 64
    embedding_image = 16
    num_patches = (image_size[0] * image_size[1]) // (patch_size[0] * patch_size[1])
    seq_len = num_patches + 1

    key = jax.random.PRNGKey(0)
    k_img, k_conv_w, k_conv_b, k_cls, k_proj, k_layers = jax.random.split(key, 6)

    x = jax.random.normal(k_img, (B, n_channels, *image_size), jnp.float32)

    # Conv2d weight [D, C, ph, pw] -> matmul weight [C*ph*pw, D]
    conv_w = jax.random.normal(
        k_conv_w, (d_model, n_channels, patch_size[0], patch_size[1]), jnp.float32
    ) * 0.02
    conv_b = jax.random.normal(k_conv_b, (d_model,), jnp.float32) * 0.02

    params = dict(
        w_patch=conv_w.reshape(d_model, -1).T,
        b_patch=conv_b.reshape(1, d_model),
        cls_token=jax.random.normal(k_cls, (1, 1, d_model), jnp.float32),
        pos_emb=sinusoidal_pe(seq_len, d_model),
        projection=jax.random.normal(k_proj, (d_model, embedding_image), jnp.float32),
        layers=[
            init_layer_params(k, d_model, ff_dim)
            for k in jax.random.split(k_layers, n_layers)
        ],
    )

    out = vit_encoder_forward(x, params, patch_size=patch_size, n_heads=n_heads)
    out = jax.block_until_ready(out)

    assert out.shape == (B, embedding_image), out.shape
    assert bool(jnp.all(jnp.isfinite(out)))
    # rows should be unit-norm
    assert bool(jnp.allclose(jnp.linalg.norm(out, axis=-1), 1.0, atol=1e-5))
    print("KERNEL_OK")
</pallas_src>

<mosaic_0001>
module attributes {stable_mosaic.version = 11 : i64} {
  func.func @_embed_kernel(%arg0: i32, %arg1: memref<1x4x192xbf16, #tpu.memory_space<vmem>>, %arg2: memref<192x32xbf16, #tpu.memory_space<vmem>>, %arg3: memref<1x32xf32, #tpu.memory_space<vmem>>, %arg4: memref<8x32xf32, #tpu.memory_space<vmem>>, %arg5: memref<1x8x32xbf16, #tpu.memory_space<vmem>>) attributes {dimension_semantics = [#tpu.dimension_semantics<parallel>], iteration_bounds = array<i64: 2>, scalar_prefetch = 0 : i64, scratch_operands = 0 : i64, tpu.core_type = #tpu.core_type<tc>, window_params = [{transform_indices = @transform_0, window_bounds = array<i64: 1, 4, 192>}, {pipeline_mode = #tpu.pipeline_mode<synchronous>, transform_indices = @transform_1, window_bounds = array<i64: 192, 32>}, {pipeline_mode = #tpu.pipeline_mode<synchronous>, transform_indices = @transform_2, window_bounds = array<i64: 1, 32>}, {pipeline_mode = #tpu.pipeline_mode<synchronous>, transform_indices = @transform_3, window_bounds = array<i64: 8, 32>}, {transform_indices = @transform_4, window_bounds = array<i64: 1, 8, 32>}]} {
    %c0 = arith.constant 0 : index
    %c0_0 = arith.constant 0 : index
    %c0_1 = arith.constant 0 : index
    %0 = vector.load %arg1[%c0, %c0_0, %c0_1] : memref<1x4x192xbf16, #tpu.memory_space<vmem>>, vector<1x4x192xbf16>
    %1 = vector.shape_cast %0 : vector<1x4x192xbf16> to vector<4x192xbf16>
    %c0_2 = arith.constant 0 : index
    %c0_3 = arith.constant 0 : index
    %2 = vector.load %arg2[%c0_2, %c0_3] : memref<192x32xbf16, #tpu.memory_space<vmem>>, vector<192x32xbf16>
    %cst = arith.constant dense<0.000000e+00> : vector<4x32xf32>
    %3 = tpu.matmul %1, %2, %cst {dimension_numbers = #tpu.dot_dimension_numbers<[1], [0], [0], [1], [0, 0, 1, 1], [], []>} : vector<4x192xbf16>, vector<192x32xbf16>, vector<4x32xf32> -> vector<4x32xf32>
    %c0_4 = arith.constant 0 : index
    %c0_5 = arith.constant 0 : index
    %4 = vector.load %arg3[%c0_4, %c0_5] : memref<1x32xf32, #tpu.memory_space<vmem>>, vector<1x32xf32>
    %5 = vector.broadcast %4 : vector<1x32xf32> to vector<4x32xf32>
    %6 = arith.addf %3, %5 : vector<4x32xf32>
    %c0_6 = arith.constant 0 : index
    %c0_7 = arith.constant 0 : index
    %7 = vector.load %arg4[%c0_6, %c0_7] : memref<8x32xf32, #tpu.memory_space<vmem>>, vector<8x32xf32>
    %8 = vector.extract_strided_slice %7 {offsets = [0, 0], sizes = [1, 32], strides = [1, 1]} : vector<8x32xf32> to vector<1x32xf32>
    %9 = vector.extract_strided_slice %7 {offsets = [1, 0], sizes = [4, 32], strides = [1, 1]} : vector<8x32xf32> to vector<4x32xf32>
    %10 = arith.addf %6, %9 : vector<4x32xf32>
    %cst_8 = arith.constant 0.000000e+00 : f32
    %11 = vector.broadcast %cst_8 : f32 to vector<3x32xf32>
    %12 = tpu.concatenate %8, %10, %11 in 0 : vector<1x32xf32>, vector<4x32xf32>, vector<3x32xf32> -> vector<8x32xf32>
    %13 = arith.truncf %12 : vector<8x32xf32> to vector<8x32xbf16>
    %c0_9 = arith.constant 0 : index
    %c0_10 = arith.constant 0 : index
    %c0_11 = arith.constant 0 : index
    %14 = vector.load %arg5[%c0_9, %c0_10, %c0_11] : memref<1x8x32xbf16, #tpu.memory_space<vmem>>, vector<1x8x32xbf16>
    %15 = vector.shape_cast %14 : vector<1x8x32xbf16> to vector<8x32xbf16>
    %16 = vector.shape_cast %13 : vector<8x32xbf16> to vector<1x8x32xbf16>
    tpu.vector_store %arg5[%c0_9, %c0_10, %c0_11], %16 {strides = array<i32>} : memref<1x8x32xbf16, #tpu.memory_space<vmem>>, vector<1x8x32xbf16>,
    return
  }
  func.func @transform_0(%arg0: i32) -> (i32, i32, i32) {
    %c0_i32 = arith.constant 0 : i32
    %c0_i32_0 = arith.constant 0 : i32
    %c0_i32_1 = arith.constant 0 : i32
    return %arg0, %c0_i32, %c0_i32_0 : i32, i32, i32
  }
  func.func @transform_1(%arg0: i32) -> (i32, i32) {
    %c0_i32 = arith.constant 0 : i32
    %c0_i32_0 = arith.constant 0 : i32
    %c0_i32_1 = arith.constant 0 : i32
    return %c0_i32, %c0_i32_0 : i32, i32
  }
  func.func @transform_2(%arg0: i32) -> (i32, i32) {
    %c0_i32 = arith.constant 0 : i32
    %c0_i32_0 = arith.constant 0 : i32
    %c0_i32_1 = arith.constant 0 : i32
    return %c0_i32, %c0_i32_0 : i32, i32
  }
  func.func @transform_3(%arg0: i32) -> (i32, i32) {
    %c0_i32 = arith.constant 0 : i32
    %c0_i32_0 = arith.constant 0 : i32
    %c0_i32_1 = arith.constant 0 : i32
    return %c0_i32, %c0_i32_0 : i32, i32
  }
  func.func @transform_4(%arg0: i32) -> (i32, i32, i32) {
    %c0_i32 = arith.constant 0 : i32
    %c0_i32_0 = arith.constant 0 : i32
    %c0_i32_1 = arith.constant 0 : i32
    return %arg0, %c0_i32, %c0_i32_0 : i32, i32, i32
  }
}

</mosaic_0001>

<bundles_post_ra>
// kernel: tpu_custom_call.1
= control target key start
LH: loop header
LB: loop body
LE: loop exit
PB: predicated region body
PF: predicated region fallthrough
CT: control target
= control target key end

     0   :  { %9 = vsyncpa [#allocation3], 0  ;;  %s740_s0 = inlined_call_operand.vmem [shape: bf16[2,4,192], index: 0, kind: input, shape index: {}]   ;;  %s741_s1 = inlined_call_operand.vmem [shape: bf16[192,32], index: 1, kind: input, shape index: {}]   ;;  %s742_s2 = inlined_call_operand.vmem [shape: f32[1,32], index: 2, kind: input, shape index: {}]   ;;  %s743_s3 = inlined_call_operand.vmem [shape: f32[8,32], index: 3, kind: input, shape index: {}]   ;;  %s744_s4 = inlined_call_operand.hbm [shape: bf16[2,8,32], index: 4, kind: output, shape index: {}]  }
   0x1   :  { %11 = vsyncpa [#allocation3 + $0x1], 0  ;;  %s611_s15 = smov 0   ;;  %s613_s16 = smov 0  }
   0x2   :  { %s615_s17 = smov 0   ;;  %s617_s18 = smov 0  }
   0x3 LB: > { %s632_s19 = sadd.s32 4294967295, %s582_s18   ;;  %s443_s20 = sadd.s32 4294967294, %s582_s18   ;;  %s582_s18 = sphi %s617_s18, %s750_s18   ;;  %s578_s17 = sphi %s615_s17, %s749_s17   ;;  %s574_s16 = sphi %s613_s16, %s748_s16   ;;  %s570_s15 = sphi %s611_s15, %s747_s15  }
   0x4   : > { %s636_s21 = sadd.s32 1, %s582_s18   ;;  %s113_s22 = sadd.s32 1, %s578_s17 }
   0x5   : > { %s110_s23 = ssub.s32 %s582_s18, %s636_s21  ;;  %p123_p0 = scmp.ne.s32.totalorder %s578_s17, %s574_s16 }
   0x6   : > { %p111_p1 = scmp.eq.s32.totalorder %s110_s23, 0  ;;  %p124_p2 = scmp.eq.s32.totalorder %s632_s19, 1 }
   0x7   : > { %p129_p3 = scmp.ne.s32.totalorder %s574_s16, %s570_s15  ;;  %p130_p4 = scmp.eq.s32.totalorder %s443_s20, 1 }
   0x8   : > { %s647_s24 = scalar_select %p111_p1, %s578_s17, %s113_s22  }
   0x9   : > { %p649_p5 = por %p124_p2, %p123_p0  ;;  %p653_p6 = por %p130_p4, %p129_p3 }
   0xa   : > { %p446_p7 = scmp.ge.s32.totalorder %s582_s18, 1  ;;  %p165_p8 = scmp.lt.s32.totalorder %s582_s18, 3 }
   0xc   : > { %p166_p9 = pnand %p446_p7, %p165_p8 }
   0xd   : > { %p191_p10 = scmp.lt.s32.totalorder (!%p166_p9), %s632_s19, 1  ;;  %s188_s20 = sand.u32 (!%p166_p9), 1, %s574_s16  }
   0xe   : > { %169 = sbr.rel (%p166_p9) target bundleno = 284 (0x11c), region = 36  ;;  %s447_s27 = sshll.u32 (!%p166_p9), %s188_s20, 2 }
   0xf   : > { %s466_s28 = sshll.u32 (!%p166_p9), %s632_s19, 6  ;;  %s190_s29 = scalar_lea.vmem (!%p166_p9), [#allocation2], %s447_s27 }
  0x10   : > { %s384_s30 = sshll.u32 (!%p166_p9), %s190_s29, 4  ;;  %s382_s7 = scalar_lea.hbm (!%p166_p9), %s744_s4, %s466_s28  ;;  %s385_s30 = int_to_ptr.vmem [resolvable:$true] %s384_s30 }
  0x11   : > { %s522_s9 = scalar_lea.vmem (!%p166_p9), %s385_s30, 64  ;;  %s585_s10 = smov (!%p166_p9), [#allocation2]  }
  0x12   : > { %p523_p11 = scmp.ne.s32.totalorder (!%p166_p9), %s385_s30, %s522_s9 }
  0x13   : > { %v510_v0 = vld [vmem:[%s741_s1 + $0x38] sm:$0xff]   ;;  %v584_v1 = vmov 0   ;;  %v511_v2 = vld [vmem:[%s741_s1 + $0x30] sm:$0xff]   ;;  %s192_s5 = scalar_select %p191_p10, %s632_s19, 1  ;;  %v512_v3 = vld [vmem:[%s741_s1 + $0x28] sm:$0xff]   ;;  %vm311_vm0 = vcmask 523264  }
  0x14   : > { %315 = vmatprep.subr.bf16.mxu0 %v584_v1  ;;  %v513_v4 = vld [vmem:[%s741_s1 + $0x20] sm:$0xff]   ;;  %v514_v7 = vld [vmem:[%s741_s1 + $0x18] sm:$0xff]   ;;  %v515_v8 = vld [vmem:[%s741_s1 + $0x10] sm:$0xff]   ;;  %vm363_vm1 = vcmask 1040384   ;;  %vm365_vm2 = vcmask 1044480   ;;  %vm368_vm3 = vcmask 257024   ;;  %p524_p12 = pnand %p523_p11, %p649_p5 }
  0x15   : > { %316 = vmatpush1.bf16.msra.mxu0 %v510_v0  ;;  %s469_s8 = sshll.u32 %s192_s5, 2  ;;  %v516_v9 = vld [vmem:[%s741_s1 + $0x8] sm:$0xff]   ;;  %v517_v10 = vld [vmem:[%s741_s1] sm:$0xff]   ;;  %v518_v11 = vld [vmem:[%s741_s1 + $0x58] sm:$0xff]   ;;  %s526_s19 = sshll.u32 %s585_s10, 4  ;;  %s527_s19 = int_to_ptr.vmem [resolvable:$false] %s526_s19 }
  0x16   : > { %317 = vmatprep.subr.bf16.mxu0 %v584_v1  ;;  %s195_s11 = scalar_lea.vmem %s740_s0, %s469_s8  ;;  %v519_v12 = vld [vmem:[%s741_s1 + $0x50] sm:$0xff]   ;;  %v520_v13 = vld [vmem:[%s741_s1 + $0x48] sm:$0xff]   ;;  %v521_v14 = vld [vmem:[%s741_s1 + $0x40] sm:$0xff]   ;;  %s371_s8 = scalar_lea.sflag [#allocation3], %s188_s20 }
  0x17   : > { %v451_v5 = vld.sshfl [vmem:[%s195_s11] sm:$0x33 pattern:$0x76325410]  ;;  %p525_p13 = pneg %p524_p12  ;;  %s528_s11 = scalar_lea.vmem %s527_s19, 128 }
  0x18   : > { %v237_v6 = vcombine.high %v451_v5, %v451_v5  ;;  %v355_v15 = vld [vmem:[%s743_s3] sm:$0xff]  ;;  %p529_p0 = scmp.lt.s32.totalorder %s385_s30, %s527_s19  ;;  %p530_p1 = scmp.lt.s32.totalorder %s528_s11, %s522_s9 }
  0x19   : > { %318 = vmatpush1.bf16.msra.mxu0 %v511_v2  ;;  %v450_v16 = vld [vmem:[%s742_s2] ss:$0 sm:$0xff]  ;;  %v357_v17 = vrot.slane %v355_v15, 1 }
  0x1a   : > { %319 = vmatprep.subr.bf16.mxu0 %v584_v1  ;;  %464 = vmatprep.mubr.msk.bf16.mxu0 %vm311_vm0, %v237_v6  ;;  %p531_p2 = por %p530_p1, %p529_p0 }
  0x1c   : > { %p532_p3 = pnand %p531_p2, %p525_p13 }
  0x1d   : > { %320 = vmatpush1.bf16.msra.mxu0 %v512_v3 }
  0x1e   : > { %321 = vmatprep.subr.bf16.mxu0 %v584_v1 }
  0x21   : > { %322 = vmatpush1.bf16.msra.mxu0 %v513_v4 }
  0x22   : > { %323 = vmatprep.subr.bf16.mxu0 %v584_v1 }
  0x25   : > { %324 = vmatpush1.bf16.msra.mxu0 %v514_v7 }
  0x26   : > { %325 = vmatprep.subr.bf16.mxu0 %v584_v1 }
  0x29   : > { %326 = vmatpush1.bf16.msra.mxu0 %v515_v8 }
  0x2a   : > { %327 = vmatprep.subr.bf16.mxu0 %v584_v1 }
  0x2d   : > { %328 = vmatpush1.bf16.msra.mxu0 %v516_v9 }
  0x2e   : > { %329 = vmatprep.subr.bf16.mxu0 %v584_v1 }
  0x31   : > { %330 = vmatpush1.bf16.msra.mxu0 %v517_v10 }
  0x32   : > { %339 = vmatprep.subr.bf16.mxu0 %v584_v1 }
  0x35   : > { %340 = vmatpush2.bf16.msra.mxu0 %v518_v11 }
  0x36   : > { %341 = vmatprep.subr.bf16.mxu0 %v584_v1 }
  0x39   : > { %342 = vmatpush2.bf16.msra.mxu0 %v519_v12 }
  0x3a   : > { %343 = vmatprep.subr.bf16.mxu0 %v584_v1 }
  0x3d   : > { %344 = vmatpush2.bf16.msra.mxu0 %v520_v13 }
  0x3e   : > { %345 = vmatprep.subr.bf16.mxu0 %v584_v1 }
  0x41   : > { %346 = vmatpush2.bf16.msra.mxu0 %v521_v14 }
  0x44   : > { %348 = vmatmul.mubr.bf16.vlgmr.msra.gmra.mxu0 %v451_v5 }
 0x104   : > { %v349_v18 = vpop.f32.mrf.mxu0 }
 0x105   : > { %v350_v19 = vadd.f32 %v450_v16, %v349_v18 }
 0x106   : > { %v351_v20 = vpop.f32.mrf.mxu0 }
 0x107   : > { %v359_v21 = vadd.f32 %v357_v17, %v350_v19 }
 0x108   : > { %v352_v22 = vpop.f32.mrf.mxu0 }
 0x109   : > { %v361_v23 = vrot.slane %v359_v21, 7 }
 0x10a   : > { %v353_v24 = vpop.f32.mrf.mxu0 }
 0x10b   : > { %v364_v25 = vsel %vm363_vm1, %v355_v15, %v361_v23 }
 0x10c   : > { %v366_v26 = vsel %vm365_vm2, %v364_v25, 0.0 }
 0x10d   : > { %v367_v27 = vpack.c.bf16 %v366_v26, %v366_v26 }
 0x10f   : > { %369 = vst.msk [vmem:[%s190_s29] sm:$0xf] %vm368_vm3, %v367_v27 }
 0x110   : > { %535 = shalt.err (!%p532_p3)
}
 0x111   : > { %s536_s12 = scalar_lea.hbm %s382_s7, 64  ;;  %s540_s20 = scalar_lea.hbm %s744_s4, 128 }
 0x112   : > { %p537_p4 = scmp.ne.s32.totalorder %s382_s7, %s536_s12  ;;  %p541_p9 = scmp.lt.s32.totalorder %s382_s7, %s744_s4 }
 0x113   : > { %p542_p10 = scmp.lt.s32.totalorder %s540_s20, %s536_s12 }
 0x114   : > { %p538_p7 = pnand %p537_p4, %p649_p5 }
 0x115   : > { %p543_p11 = por %p542_p10, %p541_p9 }
 0x116   : > { %p539_p8 = pneg %p538_p7 }
 0x118   : > { %p544_p12 = pnand %p543_p11, %p539_p8 }
 0x11a   : > { %547 = shalt.err (!%p544_p12)
}
 0x11b   : > { %470 = dma.vmem_to_hbm [thread:$0]  (%p649_p5), %s385_s30, 64, %s382_s7, %s371_s8  }
 0x11c PF: > { %p476_p13 = scmp.ge.s32.totalorder %s582_s18, 2  ;;  %s396_s27 = sand.u32 1, %s570_s15  }
 0x11d   : > { %s397_s28 = scalar_lea.sflag [#allocation3], %s396_s27 }
 0x11e   : > { %p473_p0 = pnand %p476_p13, %p653_p6 }
 0x120   : > { %p474_p1 = pneg %p473_p0 }
 0x122   : > { %565 = dma.done.wait (%p474_p1), %s397_s28, 64  }
 0x123   : > { %567 = vsyncadd (%p474_p1), %s397_s28, 4294967232  ;;  %p14_p2 = scmp.ge.s32.totalorder %s636_s21, 4   ;;  %s747_s15 = smov %s574_s16 }
 0x124   : > { %s748_s16 = smov %s578_s17  ;;  %s749_s17 = smov %s647_s24 }
 0x125   : > { %s750_s18 = smov %s636_s21  ;;  %16 = sbr.rel (!%p14_p2) target bundleno = 3 (0x3), region = 71 }
 0x12a   :  { %402 = vsyncpa [#allocation3], 1 }
 0x12b   :  { %404 = vsyncpa [#allocation3 + $0x1], 1 }

</bundles_post_ra>
